<compile_context>
chip_gen: v6e
topology: v6e:2x2x1
jax: 0.10.0
libtpu: 0.0.40
codegen_flags: <defaults>
</compile_context>

<pallas_src>
import jax
import jax.numpy as jnp
from jax.experimental import pallas as pl
from jax.experimental.pallas import tpu as pltpu
import numpy as np


# Offsets into the flat SMEM parameter vector (44 f32 scalars, row-major).
_W_SEN, _B_SEN = 0, 9      # sen_L:    W [3,3], b [3]
_W_SAR, _B_SAR = 12, 21    # sar_L:    W [3,3], b [3]
_W_RSEN, _B_RSEN = 24, 33  # re_sen_L: W [3,3], b [3]
_W_RSAR, _B_RSAR = 36, 42  # re_sar_L: W [2,3], b [2]
_N_PARAMS = 44


def q_model_kernel(p_ref, sen_ref, sa_ref, out_ref):
    """p_ref:   [44]          f32 parameters in SMEM.
    sen_ref: [3, TS, 128]  sen features, batch on (sublane, lane).
    sa_ref:  [3, TS, 128]  sa  features, batch on (sublane, lane).
    out_ref: [5, TS, 128]  planes 0..1 = sar output, planes 2..4 = sen output."""

    def p(i):
        return p_ref[i]

    # Dense (TS, 128) feature slabs (full first-axis reads, no masked strips).
    s = [sen_ref[k] for k in range(3)]
    a = [sa_ref[k] for k in range(3)]

    def lin3(rows, w_off, b_off, j):
        # y_j = sum_k W[j, k] * rows[k] + b[j]  (scalar-broadcast VPU FMAs).
        acc = rows[0] * p(w_off + 3 * j + 0)
        acc = acc + rows[1] * p(w_off + 3 * j + 1)
        acc = acc + rows[2] * p(w_off + 3 * j + 2)
        return acc + p(b_off + j)

    # Encoder angles -> cosines; each cos is computed exactly once per wire.
    c = [jnp.cos(lin3(s, _W_SEN, _B_SEN, j)) for j in range(3)] + \
        [jnp.cos(lin3(a, _W_SAR, _B_SAR, j)) for j in range(3)]

    # Analytic PauliZ expectations after the two CNOT rings.
    z1 = c[0] * c[1]
    z4 = c[3] * c[4]
    zs_sen = [c[1] * c[2], z1, z1 * c[2]]    # <Z0>, <Z1>, <Z2>
    zs_sar = [c[4] * c[5], z4, z4 * c[5]]    # <Z3>, <Z4>, <Z5>

    # re_sar_L -> planes 0..1, re_sen_L -> planes 2..4 (dense, unmasked stores).
    for j in range(2):
        out_ref[j] = lin3(zs_sar, _W_RSAR, _B_RSAR, j)
    for j in range(3):
        out_ref[2 + j] = lin3(zs_sen, _W_RSEN, _B_RSEN, j)


def _choose_tiling(n_blocks, batch_tile_lanes):
    """Pick TS (# of 128-lane blocks per grid step) and the padded block count.

    Sublane rule: TS must be a multiple of 8 or equal to the full extent.
    Prefers >=2 grid steps (v7x dual-TC sharding) once the batch is big enough."""
    ts_max = max(8, (batch_tile_lanes // 128) // 8 * 8)
    if n_blocks <= 8:
        return n_blocks, n_blocks                      # single step; TS == full dim
    n_steps = max(2, pl.cdiv(n_blocks, ts_max))
    ts = min(ts_max, pl.cdiv(pl.cdiv(n_blocks, n_steps), 8) * 8)
    return ts, pl.cdiv(n_blocks, ts) * ts


def init_params(key):
    """Deterministic init mimicking nn.Linear default uniform(-1/sqrt(in), 1/sqrt(in))."""
    def linear(key, in_f, out_f):
        k_w, k_b = jax.random.split(key)
        bound = 1.0 / np.sqrt(in_f)
        w = jax.random.uniform(k_w, (out_f, in_f), jnp.float32, -bound, bound)
        b = jax.random.uniform(k_b, (out_f,), jnp.float32, -bound, bound)
        return w, b

    k1, k2, k3, k4 = jax.random.split(key, 4)
    w_sar, b_sar = linear(k1, 3, 3)     # sar_L
    w_sen, b_sen = linear(k2, 3, 3)     # sen_L
    w_rsar, b_rsar = linear(k3, 3, 2)   # re_sar_L
    w_rsen, b_rsen = linear(k4, 3, 3)   # re_sen_L
    return dict(w_sar=w_sar, b_sar=b_sar, w_sen=w_sen, b_sen=b_sen,
                w_rsar=w_rsar, b_rsar=b_rsar, w_rsen=w_rsen, b_rsen=b_rsen)


def q_model_forward(sa, sen, params, *, batch_tile=64 * 1024):
    B = sa.shape[0]
    n_blocks = pl.cdiv(B, 128)
    ts, n_blocks_p = _choose_tiling(n_blocks, batch_tile)
    Bp = n_blocks_p * 128

    def planes(x):
        # [B, 3] -> [3, n_blocks_p, 128]: transpose + free row-major reshape;
        # tail padding only when B is not already tile-aligned.
        x = jnp.asarray(x, jnp.float32).T
        if Bp != B:
            x = jnp.pad(x, ((0, 0), (0, Bp - B)))
        return x.reshape(3, n_blocks_p, 128)

    sen_p = planes(sen)
    sa_p = planes(sa)

    # Flat parameter vector for SMEM (layout must match the _W_*/_B_* offsets).
    p = jnp.concatenate([
        jnp.asarray(params["w_sen"], jnp.float32).reshape(-1),
        jnp.asarray(params["b_sen"], jnp.float32).reshape(-1),
        jnp.asarray(params["w_sar"], jnp.float32).reshape(-1),
        jnp.asarray(params["b_sar"], jnp.float32).reshape(-1),
        jnp.asarray(params["w_rsen"], jnp.float32).reshape(-1),
        jnp.asarray(params["b_rsen"], jnp.float32).reshape(-1),
        jnp.asarray(params["w_rsar"], jnp.float32).reshape(-1),
        jnp.asarray(params["b_rsar"], jnp.float32).reshape(-1),
    ])
    assert p.shape[0] == _N_PARAMS

    # Double-buffered in+out tile footprint; keep the scoped-VMEM cap explicit.
    vmem_need = 2 * (6 + 5) * ts * 128 * 4
    vmem_limit = int(max(32 * 1024 * 1024, min(2 * vmem_need, 64 * 1024 * 1024)))

    out = pl.pallas_call(
        q_model_kernel,
        grid=(n_blocks_p // ts,),
        in_specs=[pl.BlockSpec(memory_space=pltpu.MemorySpace.SMEM),   # params
                  pl.BlockSpec((3, ts, 128), lambda i: (0, i, 0)),     # sen planes
                  pl.BlockSpec((3, ts, 128), lambda i: (0, i, 0))],    # sa planes
        out_specs=pl.BlockSpec((5, ts, 128), lambda i: (0, i, 0)),
        out_shape=jax.ShapeDtypeStruct((5, n_blocks_p, 128), jnp.float32),
        compiler_params=pltpu.CompilerParams(
            dimension_semantics=("parallel",),
            vmem_limit_bytes=vmem_limit),
    )(p, sen_p, sa_p)

    out = out.reshape(5, Bp)
    sar_out = out[0:2, :B].T   # [B, 2]
    sen_out = out[2:5, :B].T   # [B, 3]
    return sar_out, sen_out


def q_model_reference(sa, sen, params):
    """Pure-JAX reference of the same analytic forward."""
    sa_t = sa @ params["w_sar"].T + params["b_sar"]
    sen_t = sen @ params["w_sen"].T + params["b_sen"]
    c = jnp.cos(jnp.concatenate([sen_t, sa_t], axis=1))   # angles per wire 0..5
    z0 = c[:, 1] * c[:, 2]
    z1 = c[:, 0] * c[:, 1]
    z2 = c[:, 0] * c[:, 1] * c[:, 2]
    z3 = c[:, 4] * c[:, 5]
    z4 = c[:, 3] * c[:, 4]
    z5 = c[:, 3] * c[:, 4] * c[:, 5]
    x = jnp.stack([z0, z1, z2, z3, z4, z5], axis=1)
    sar = x[:, 3:6] @ params["w_rsar"].T + params["b_rsar"]
    sen_o = x[:, 0:3] @ params["w_rsen"].T + params["b_rsen"]
    return sar, sen_o


if __name__ == "__main__":
    key = jax.random.PRNGKey(0)
    k_p, k_sa, k_sen = jax.random.split(key, 3)

    B = 8
    params = init_params(k_p)
    sa = jax.random.normal(k_sa, (B, 3), jnp.float32)
    sen = jax.random.normal(k_sen, (B, 3), jnp.float32)

    sar_out, sen_out = q_model_forward(sa, sen, params)
    jax.block_until_ready((sar_out, sen_out))

    sar_ref, sen_ref = q_model_reference(sa, sen, params)
    np.testing.assert_allclose(np.asarray(sar_out), np.asarray(sar_ref),
                               rtol=1e-5, atol=1e-5)
    np.testing.assert_allclose(np.asarray(sen_out), np.asarray(sen_ref),
                               rtol=1e-5, atol=1e-5)

    assert sar_out.shape == (B, 2) and sen_out.shape == (B, 3)
    print("KERNEL_OK")
</pallas_src>

<mosaic_0001>
module attributes {stable_mosaic.version = 11 : i64} {
  func.func @q_model_kernel(%arg0: i32, %arg1: memref<44xf32, #tpu.memory_space<smem>>, %arg2: memref<3x1x128xf32, #tpu.memory_space<vmem>>, %arg3: memref<3x1x128xf32, #tpu.memory_space<vmem>>, %arg4: memref<5x1x128xf32, #tpu.memory_space<vmem>>) attributes {dimension_semantics = [#tpu.dimension_semantics<parallel>], iteration_bounds = array<i64: 1>, scalar_prefetch = 0 : i64, scratch_operands = 0 : i64, tpu.core_type = #tpu.core_type<tc>, window_params = [{transform_indices = @transform_0, window_bounds = array<i64: 44>}, {transform_indices = @transform_1, window_bounds = array<i64: 3, 1, 128>}, {transform_indices = @transform_2, window_bounds = array<i64: 3, 1, 128>}, {transform_indices = @transform_3, window_bounds = array<i64: 5, 1, 128>}]} {
    %c0 = arith.constant 0 : index
    %c0_0 = arith.constant 0 : index
    %c0_1 = arith.constant 0 : index
    %0 = vector.load %arg2[%c0, %c0_0, %c0_1] : memref<3x1x128xf32, #tpu.memory_space<vmem>>, vector<1x1x128xf32>
    %1 = vector.shape_cast %0 : vector<1x1x128xf32> to vector<1x128xf32>
    %c1 = arith.constant 1 : index
    %c0_2 = arith.constant 0 : index
    %c0_3 = arith.constant 0 : index
    %2 = vector.load %arg2[%c1, %c0_2, %c0_3] : memref<3x1x128xf32, #tpu.memory_space<vmem>>, vector<1x1x128xf32>
    %3 = vector.shape_cast %2 : vector<1x1x128xf32> to vector<1x128xf32>
    %c2 = arith.constant 2 : index
    %c0_4 = arith.constant 0 : index
    %c0_5 = arith.constant 0 : index
    %4 = vector.load %arg2[%c2, %c0_4, %c0_5] : memref<3x1x128xf32, #tpu.memory_space<vmem>>, vector<1x1x128xf32>
    %5 = vector.shape_cast %4 : vector<1x1x128xf32> to vector<1x128xf32>
    %c0_6 = arith.constant 0 : index
    %c0_7 = arith.constant 0 : index
    %c0_8 = arith.constant 0 : index
    %6 = vector.load %arg3[%c0_6, %c0_7, %c0_8] : memref<3x1x128xf32, #tpu.memory_space<vmem>>, vector<1x1x128xf32>
    %7 = vector.shape_cast %6 : vector<1x1x128xf32> to vector<1x128xf32>
    %c1_9 = arith.constant 1 : index
    %c0_10 = arith.constant 0 : index
    %c0_11 = arith.constant 0 : index
    %8 = vector.load %arg3[%c1_9, %c0_10, %c0_11] : memref<3x1x128xf32, #tpu.memory_space<vmem>>, vector<1x1x128xf32>
    %9 = vector.shape_cast %8 : vector<1x1x128xf32> to vector<1x128xf32>
    %c2_12 = arith.constant 2 : index
    %c0_13 = arith.constant 0 : index
    %c0_14 = arith.constant 0 : index
    %10 = vector.load %arg3[%c2_12, %c0_13, %c0_14] : memref<3x1x128xf32, #tpu.memory_space<vmem>>, vector<1x1x128xf32>
    %11 = vector.shape_cast %10 : vector<1x1x128xf32> to vector<1x128xf32>
    %c0_15 = arith.constant 0 : index
    %12 = memref.load %arg1[%c0_15] : memref<44xf32, #tpu.memory_space<smem>>
    %13 = vector.broadcast %12 : f32 to vector<1x128xf32>
    %14 = arith.mulf %1, %13 : vector<1x128xf32>
    %c1_16 = arith.constant 1 : index
    %15 = memref.load %arg1[%c1_16] : memref<44xf32, #tpu.memory_space<smem>>
    %16 = vector.broadcast %15 : f32 to vector<1x128xf32>
    %17 = arith.mulf %3, %16 : vector<1x128xf32>
    %18 = arith.addf %14, %17 : vector<1x128xf32>
    %c2_17 = arith.constant 2 : index
    %19 = memref.load %arg1[%c2_17] : memref<44xf32, #tpu.memory_space<smem>>
    %20 = vector.broadcast %19 : f32 to vector<1x128xf32>
    %21 = arith.mulf %5, %20 : vector<1x128xf32>
    %22 = arith.addf %18, %21 : vector<1x128xf32>
    %c9 = arith.constant 9 : index
    %23 = memref.load %arg1[%c9] : memref<44xf32, #tpu.memory_space<smem>>
    %24 = vector.broadcast %23 : f32 to vector<1x128xf32>
    %25 = arith.addf %22, %24 : vector<1x128xf32>
    %26 = math.cos %25 : vector<1x128xf32>
    %c3 = arith.constant 3 : index
    %27 = memref.load %arg1[%c3] : memref<44xf32, #tpu.memory_space<smem>>
    %28 = vector.broadcast %27 : f32 to vector<1x128xf32>
    %29 = arith.mulf %1, %28 : vector<1x128xf32>
    %c4 = arith.constant 4 : index
    %30 = memref.load %arg1[%c4] : memref<44xf32, #tpu.memory_space<smem>>
    %31 = vector.broadcast %30 : f32 to vector<1x128xf32>
    %32 = arith.mulf %3, %31 : vector<1x128xf32>
    %33 = arith.addf %29, %32 : vector<1x128xf32>
    %c5 = arith.constant 5 : index
    %34 = memref.load %arg1[%c5] : memref<44xf32, #tpu.memory_space<smem>>
    %35 = vector.broadcast %34 : f32 to vector<1x128xf32>
    %36 = arith.mulf %5, %35 : vector<1x128xf32>
    %37 = arith.addf %33, %36 : vector<1x128xf32>
    %c10 = arith.constant 10 : index
    %38 = memref.load %arg1[%c10] : memref<44xf32, #tpu.memory_space<smem>>
    %39 = vector.broadcast %38 : f32 to vector<1x128xf32>
    %40 = arith.addf %37, %39 : vector<1x128xf32>
    %41 = math.cos %40 : vector<1x128xf32>
    %c6 = arith.constant 6 : index
    %42 = memref.load %arg1[%c6] : memref<44xf32, #tpu.memory_space<smem>>
    %43 = vector.broadcast %42 : f32 to vector<1x128xf32>
    %44 = arith.mulf %1, %43 : vector<1x128xf32>
    %c7 = arith.constant 7 : index
    %45 = memref.load %arg1[%c7] : memref<44xf32, #tpu.memory_space<smem>>
    %46 = vector.broadcast %45 : f32 to vector<1x128xf32>
    %47 = arith.mulf %3, %46 : vector<1x128xf32>
    %48 = arith.addf %44, %47 : vector<1x128xf32>
    %c8 = arith.constant 8 : index
    %49 = memref.load %arg1[%c8] : memref<44xf32, #tpu.memory_space<smem>>
    %50 = vector.broadcast %49 : f32 to vector<1x128xf32>
    %51 = arith.mulf %5, %50 : vector<1x128xf32>
    %52 = arith.addf %48, %51 : vector<1x128xf32>
    %c11 = arith.constant 11 : index
    %53 = memref.load %arg1[%c11] : memref<44xf32, #tpu.memory_space<smem>>
    %54 = vector.broadcast %53 : f32 to vector<1x128xf32>
    %55 = arith.addf %52, %54 : vector<1x128xf32>
    %56 = math.cos %55 : vector<1x128xf32>
    %c12 = arith.constant 12 : index
    %57 = memref.load %arg1[%c12] : memref<44xf32, #tpu.memory_space<smem>>
    %58 = vector.broadcast %57 : f32 to vector<1x128xf32>
    %59 = arith.mulf %7, %58 : vector<1x128xf32>
    %c13 = arith.constant 13 : index
    %60 = memref.load %arg1[%c13] : memref<44xf32, #tpu.memory_space<smem>>
    %61 = vector.broadcast %60 : f32 to vector<1x128xf32>
    %62 = arith.mulf %9, %61 : vector<1x128xf32>
    %63 = arith.addf %59, %62 : vector<1x128xf32>
    %c14 = arith.constant 14 : index
    %64 = memref.load %arg1[%c14] : memref<44xf32, #tpu.memory_space<smem>>
    %65 = vector.broadcast %64 : f32 to vector<1x128xf32>
    %66 = arith.mulf %11, %65 : vector<1x128xf32>
    %67 = arith.addf %63, %66 : vector<1x128xf32>
    %c21 = arith.constant 21 : index
    %68 = memref.load %arg1[%c21] : memref<44xf32, #tpu.memory_space<smem>>
    %69 = vector.broadcast %68 : f32 to vector<1x128xf32>
    %70 = arith.addf %67, %69 : vector<1x128xf32>
    %71 = math.cos %70 : vector<1x128xf32>
    %c15 = arith.constant 15 : index
    %72 = memref.load %arg1[%c15] : memref<44xf32, #tpu.memory_space<smem>>
    %73 = vector.broadcast %72 : f32 to vector<1x128xf32>
    %74 = arith.mulf %7, %73 : vector<1x128xf32>
    %c16 = arith.constant 16 : index
    %75 = memref.load %arg1[%c16] : memref<44xf32, #tpu.memory_space<smem>>
    %76 = vector.broadcast %75 : f32 to vector<1x128xf32>
    %77 = arith.mulf %9, %76 : vector<1x128xf32>
    %78 = arith.addf %74, %77 : vector<1x128xf32>
    %c17 = arith.constant 17 : index
    %79 = memref.load %arg1[%c17] : memref<44xf32, #tpu.memory_space<smem>>
    %80 = vector.broadcast %79 : f32 to vector<1x128xf32>
    %81 = arith.mulf %11, %80 : vector<1x128xf32>
    %82 = arith.addf %78, %81 : vector<1x128xf32>
    %c22 = arith.constant 22 : index
    %83 = memref.load %arg1[%c22] : memref<44xf32, #tpu.memory_space<smem>>
    %84 = vector.broadcast %83 : f32 to vector<1x128xf32>
    %85 = arith.addf %82, %84 : vector<1x128xf32>
    %86 = math.cos %85 : vector<1x128xf32>
    %c18 = arith.constant 18 : index
    %87 = memref.load %arg1[%c18] : memref<44xf32, #tpu.memory_space<smem>>
    %88 = vector.broadcast %87 : f32 to vector<1x128xf32>
    %89 = arith.mulf %7, %88 : vector<1x128xf32>
    %c19 = arith.constant 19 : index
    %90 = memref.load %arg1[%c19] : memref<44xf32, #tpu.memory_space<smem>>
    %91 = vector.broadcast %90 : f32 to vector<1x128xf32>
    %92 = arith.mulf %9, %91 : vector<1x128xf32>
    %93 = arith.addf %89, %92 : vector<1x128xf32>
    %c20 = arith.constant 20 : index
    %94 = memref.load %arg1[%c20] : memref<44xf32, #tpu.memory_space<smem>>
    %95 = vector.broadcast %94 : f32 to vector<1x128xf32>
    %96 = arith.mulf %11, %95 : vector<1x128xf32>
    %97 = arith.addf %93, %96 : vector<1x128xf32>
    %c23 = arith.constant 23 : index
    %98 = memref.load %arg1[%c23] : memref<44xf32, #tpu.memory_space<smem>>
    %99 = vector.broadcast %98 : f32 to vector<1x128xf32>
    %100 = arith.addf %97, %99 : vector<1x128xf32>
    %101 = math.cos %100 : vector<1x128xf32>
    %102 = arith.mulf %26, %41 : vector<1x128xf32>
    %103 = arith.mulf %71, %86 : vector<1x128xf32>
    %104 = arith.mulf %41, %56 : vector<1x128xf32>
    %105 = arith.mulf %102, %56 : vector<1x128xf32>
    %106 = arith.mulf %86, %101 : vector<1x128xf32>
    %107 = arith.mulf %103, %101 : vector<1x128xf32>
    %c36 = arith.constant 36 : index
    %108 = memref.load %arg1[%c36] : memref<44xf32, #tpu.memory_space<smem>>
    %109 = vector.broadcast %108 : f32 to vector<1x128xf32>
    %110 = arith.mulf %106, %109 : vector<1x128xf32>
    %c37 = arith.constant 37 : index
    %111 = memref.load %arg1[%c37] : memref<44xf32, #tpu.memory_space<smem>>
    %112 = vector.broadcast %111 : f32 to vector<1x128xf32>
    %113 = arith.mulf %103, %112 : vector<1x128xf32>
    %114 = arith.addf %110, %113 : vector<1x128xf32>
    %c38 = arith.constant 38 : index
    %115 = memref.load %arg1[%c38] : memref<44xf32, #tpu.memory_space<smem>>
    %116 = vector.broadcast %115 : f32 to vector<1x128xf32>
    %117 = arith.mulf %107, %116 : vector<1x128xf32>
    %118 = arith.addf %114, %117 : vector<1x128xf32>
    %c42 = arith.constant 42 : index
    %119 = memref.load %arg1[%c42] : memref<44xf32, #tpu.memory_space<smem>>
    %120 = vector.broadcast %119 : f32 to vector<1x128xf32>
    %121 = arith.addf %118, %120 : vector<1x128xf32>
    %c0_18 = arith.constant 0 : index
    %c0_19 = arith.constant 0 : index
    %c0_20 = arith.constant 0 : index
    %122 = vector.load %arg4[%c0_18, %c0_19, %c0_20] : memref<5x1x128xf32, #tpu.memory_space<vmem>>, vector<1x1x128xf32>
    %123 = vector.shape_cast %122 : vector<1x1x128xf32> to vector<1x128xf32>
    %124 = vector.shape_cast %121 : vector<1x128xf32> to vector<1x1x128xf32>
    tpu.vector_store %arg4[%c0_18, %c0_19, %c0_20], %124 {strides = array<i32>} : memref<5x1x128xf32, #tpu.memory_space<vmem>>, vector<1x1x128xf32>,
    %c39 = arith.constant 39 : index
    %125 = memref.load %arg1[%c39] : memref<44xf32, #tpu.memory_space<smem>>
    %126 = vector.broadcast %125 : f32 to vector<1x128xf32>
    %127 = arith.mulf %106, %126 : vector<1x128xf32>
    %c40 = arith.constant 40 : index
    %128 = memref.load %arg1[%c40] : memref<44xf32, #tpu.memory_space<smem>>
    %129 = vector.broadcast %128 : f32 to vector<1x128xf32>
    %130 = arith.mulf %103, %129 : vector<1x128xf32>
    %131 = arith.addf %127, %130 : vector<1x128xf32>
    %c41 = arith.constant 41 : index
    %132 = memref.load %arg1[%c41] : memref<44xf32, #tpu.memory_space<smem>>
    %133 = vector.broadcast %132 : f32 to vector<1x128xf32>
    %134 = arith.mulf %107, %133 : vector<1x128xf32>
    %135 = arith.addf %131, %134 : vector<1x128xf32>
    %c43 = arith.constant 43 : index
    %136 = memref.load %arg1[%c43] : memref<44xf32, #tpu.memory_space<smem>>
    %137 = vector.broadcast %136 : f32 to vector<1x128xf32>
    %138 = arith.addf %135, %137 : vector<1x128xf32>
    %c1_21 = arith.constant 1 : index
    %c0_22 = arith.constant 0 : index
    %c0_23 = arith.constant 0 : index
    %139 = vector.load %arg4[%c1_21, %c0_22, %c0_23] : memref<5x1x128xf32, #tpu.memory_space<vmem>>, vector<1x1x128xf32>
    %140 = vector.shape_cast %139 : vector<1x1x128xf32> to vector<1x128xf32>
    %141 = vector.shape_cast %138 : vector<1x128xf32> to vector<1x1x128xf32>
    tpu.vector_store %arg4[%c1_21, %c0_22, %c0_23], %141 {strides = array<i32>} : memref<5x1x128xf32, #tpu.memory_space<vmem>>, vector<1x1x128xf32>,
    %c24 = arith.constant 24 : index
    %142 = memref.load %arg1[%c24] : memref<44xf32, #tpu.memory_space<smem>>
    %143 = vector.broadcast %142 : f32 to vector<1x128xf32>
    %144 = arith.mulf %104, %143 : vector<1x128xf32>
    %c25 = arith.constant 25 : index
    %145 = memref.load %arg1[%c25] : memref<44xf32, #tpu.memory_space<smem>>
    %146 = vector.broadcast %145 : f32 to vector<1x128xf32>
    %147 = arith.mulf %102, %146 : vector<1x128xf32>
    %148 = arith.addf %144, %147 : vector<1x128xf32>
    %c26 = arith.constant 26 : index
    %149 = memref.load %arg1[%c26] : memref<44xf32, #tpu.memory_space<smem>>
    %150 = vector.broadcast %149 : f32 to vector<1x128xf32>
    %151 = arith.mulf %105, %150 : vector<1x128xf32>
    %152 = arith.addf %148, %151 : vector<1x128xf32>
    %c33 = arith.constant 33 : index
    %153 = memref.load %arg1[%c33] : memref<44xf32, #tpu.memory_space<smem>>
    %154 = vector.broadcast %153 : f32 to vector<1x128xf32>
    %155 = arith.addf %152, %154 : vector<1x128xf32>
    %c2_24 = arith.constant 2 : index
    %c0_25 = arith.constant 0 : index
    %c0_26 = arith.constant 0 : index
    %156 = vector.load %arg4[%c2_24, %c0_25, %c0_26] : memref<5x1x128xf32, #tpu.memory_space<vmem>>, vector<1x1x128xf32>
    %157 = vector.shape_cast %156 : vector<1x1x128xf32> to vector<1x128xf32>
    %158 = vector.shape_cast %155 : vector<1x128xf32> to vector<1x1x128xf32>
    tpu.vector_store %arg4[%c2_24, %c0_25, %c0_26], %158 {strides = array<i32>} : memref<5x1x128xf32, #tpu.memory_space<vmem>>, vector<1x1x128xf32>,
    %c27 = arith.constant 27 : index
    %159 = memref.load %arg1[%c27] : memref<44xf32, #tpu.memory_space<smem>>
    %160 = vector.broadcast %159 : f32 to vector<1x128xf32>
    %161 = arith.mulf %104, %160 : vector<1x128xf32>
    %c28 = arith.constant 28 : index
    %162 = memref.load %arg1[%c28] : memref<44xf32, #tpu.memory_space<smem>>
    %163 = vector.broadcast %162 : f32 to vector<1x128xf32>
    %164 = arith.mulf %102, %163 : vector<1x128xf32>
    %165 = arith.addf %161, %164 : vector<1x128xf32>
    %c29 = arith.constant 29 : index
    %166 = memref.load %arg1[%c29] : memref<44xf32, #tpu.memory_space<smem>>
    %167 = vector.broadcast %166 : f32 to vector<1x128xf32>
    %168 = arith.mulf %105, %167 : vector<1x128xf32>
    %169 = arith.addf %165, %168 : vector<1x128xf32>
    %c34 = arith.constant 34 : index
    %170 = memref.load %arg1[%c34] : memref<44xf32, #tpu.memory_space<smem>>
    %171 = vector.broadcast %170 : f32 to vector<1x128xf32>
    %172 = arith.addf %169, %171 : vector<1x128xf32>
    %c3_27 = arith.constant 3 : index
    %c0_28 = arith.constant 0 : index
    %c0_29 = arith.constant 0 : index
    %173 = vector.load %arg4[%c3_27, %c0_28, %c0_29] : memref<5x1x128xf32, #tpu.memory_space<vmem>>, vector<1x1x128xf32>
    %174 = vector.shape_cast %173 : vector<1x1x128xf32> to vector<1x128xf32>
    %175 = vector.shape_cast %172 : vector<1x128xf32> to vector<1x1x128xf32>
    tpu.vector_store %arg4[%c3_27, %c0_28, %c0_29], %175 {strides = array<i32>} : memref<5x1x128xf32, #tpu.memory_space<vmem>>, vector<1x1x128xf32>,
    %c30 = arith.constant 30 : index
    %176 = memref.load %arg1[%c30] : memref<44xf32, #tpu.memory_space<smem>>
    %177 = vector.broadcast %176 : f32 to vector<1x128xf32>
    %178 = arith.mulf %104, %177 : vector<1x128xf32>
    %c31 = arith.constant 31 : index
    %179 = memref.load %arg1[%c31] : memref<44xf32, #tpu.memory_space<smem>>
    %180 = vector.broadcast %179 : f32 to vector<1x128xf32>
    %181 = arith.mulf %102, %180 : vector<1x128xf32>
    %182 = arith.addf %178, %181 : vector<1x128xf32>
    %c32 = arith.constant 32 : index
    %183 = memref.load %arg1[%c32] : memref<44xf32, #tpu.memory_space<smem>>
    %184 = vector.broadcast %183 : f32 to vector<1x128xf32>
    %185 = arith.mulf %105, %184 : vector<1x128xf32>
    %186 = arith.addf %182, %185 : vector<1x128xf32>
    %c35 = arith.constant 35 : index
    %187 = memref.load %arg1[%c35] : memref<44xf32, #tpu.memory_space<smem>>
    %188 = vector.broadcast %187 : f32 to vector<1x128xf32>
    %189 = arith.addf %186, %188 : vector<1x128xf32>
    %c4_30 = arith.constant 4 : index
    %c0_31 = arith.constant 0 : index
    %c0_32 = arith.constant 0 : index
    %190 = vector.load %arg4[%c4_30, %c0_31, %c0_32] : memref<5x1x128xf32, #tpu.memory_space<vmem>>, vector<1x1x128xf32>
    %191 = vector.shape_cast %190 : vector<1x1x128xf32> to vector<1x128xf32>
    %192 = vector.shape_cast %189 : vector<1x128xf32> to vector<1x1x128xf32>
    tpu.vector_store %arg4[%c4_30, %c0_31, %c0_32], %192 {strides = array<i32>} : memref<5x1x128xf32, #tpu.memory_space<vmem>>, vector<1x1x128xf32>,
    return
  }
  func.func @transform_0(%arg0: i32) -> i32 {
    %c0_i32 = arith.constant 0 : i32
    %c0_i32_0 = arith.constant 0 : i32
    return %c0_i32 : i32
  }
  func.func @transform_1(%arg0: i32) -> (i32, i32, i32) {
    %c0_i32 = arith.constant 0 : i32
    %c0_i32_0 = arith.constant 0 : i32
    %c0_i32_1 = arith.constant 0 : i32
    return %c0_i32, %arg0, %c0_i32_0 : i32, i32, i32
  }
  func.func @transform_2(%arg0: i32) -> (i32, i32, i32) {
    %c0_i32 = arith.constant 0 : i32
    %c0_i32_0 = arith.constant 0 : i32
    %c0_i32_1 = arith.constant 0 : i32
    return %c0_i32, %arg0, %c0_i32_0 : i32, i32, i32
  }
  func.func @transform_3(%arg0: i32) -> (i32, i32, i32) {
    %c0_i32 = arith.constant 0 : i32
    %c0_i32_0 = arith.constant 0 : i32
    %c0_i32_1 = arith.constant 0 : i32
    return %c0_i32, %arg0, %c0_i32_0 : i32, i32, i32
  }
}

</mosaic_0001>

<bundles_post_ra>
// kernel: tpu_custom_call.1
= control target key start
LH: loop header
LB: loop body
LE: loop exit
PB: predicated region body
PF: predicated region fallthrough
CT: control target
= control target key end

     0   :  { %8 = vsyncpa [#allocation5], 0  ;;  %s1716_s0 = inlined_call_operand.hbm [shape: f32[44], index: 0, kind: input, shape index: {}]   ;;  %s1717_s1 = inlined_call_operand.hbm [shape: f32[3,1,128], index: 1, kind: input, shape index: {}]   ;;  %s1718_s2 = inlined_call_operand.vmem [shape: f32[3,1,128], index: 2, kind: input, shape index: {}]   ;;  %s1719_s3 = inlined_call_operand.hbm [shape: f32[5,1,128], index: 3, kind: output, shape index: {}]  }
   0x1   :  { %9 = vsyncpa [#allocation3], 0 }
   0x2   :  { %10 = vsyncpa [#allocation4], 0  ;;  %s1037_s12 = smov [#allocation2]   ;;  %s1038_s15 = smov [#allocation6]  }
   0x3   :  { %18 = dma.hbm_to_smem %s1716_s0, 16, %s1037_s12, [#allocation5]  }
   0x4   :  { %s24_s16 = sshll.u32 %s1038_s15, 4  ;;  %s25_s16 = int_to_ptr.vmem [resolvable:$true] %s24_s16 }
   0x5   :  { %s999_s17 = scalar_lea.vmem %s25_s16, 48  ;;  %s1003_s18 = scalar_lea.vmem %s25_s16, 64 }
   0x6   :  { %p1000_p0 = scmp.ne.s32.totalorder %s25_s16, %s999_s17  ;;  %p1004_p1 = scmp.lt.s32.totalorder %s25_s16, %s25_s16 }
   0x7   :  { %p1005_p2 = scmp.lt.s32.totalorder %s1003_s18, %s999_s17 }
   0x9   :  { %p1006_p3 = por %p1005_p2, %p1004_p1 }
   0xb   :  { %p1007_p4 = pnand %p1006_p3, %p1000_p0 }
   0xd   :  { %1010 = shalt.err (!%p1007_p4)
}
   0xe   :  { %s1039_s19 = smov 16   ;;  %s1040_s20 = smov 1  }
   0xf   :  { %30 = dma.hbm_to_vmem [thread:$0]  %s1717_s1, 48, %s25_s16, [#allocation3], %s1039_s19, %s1039_s19, %s1040_s20  }
  0x10   :  { %1031 = dma.done.wait [#allocation5], 16  }
  0x11   :  { %1032 = vsyncadd [#allocation5], 4294967280 }
  0x12   :  { %1033 = dma.done.wait [#allocation3], 48  }
  0x13   :  { %1034 = vsyncadd [#allocation3], 4294967248 }
  0x14   :  { %39 = sfence }
  0x15   :  { %s50_s0 = sld [smem:[#allocation2]]  ;;  %v40_v0 = vld [vmem:[#allocation6] sm:$0x1]  ;;  %v42_v1 = vld [vmem:[#allocation6 + $0x1] sm:$0x1] }
  0x16   :  { %s857_s23 = sld [smem:[#allocation2 + $0x1]]  ;;  %v44_v2 = vld [vmem:[#allocation6 + $0x2] sm:$0x1]  ;;  %v1041_v52 = vmov 683565275  }
  0x17   :  { %s858_s24 = sld [smem:[#allocation2 + $0x2]]  ;;  %v1042_v54 = vmov 2475754826   ;;  %v1043_v56 = vmov 2131351028  }
  0x18   :  { %s859_s25 = sld [smem:[#allocation2 + $0x9]]  ;;  %v1044_v58 = vmov 2102212464   ;;  %v1045_v60 = vmov 920167782  }
  0x19   :  { %s864_s26 = sld [smem:[#allocation2 + $0x3]] }
  0x1a   :  { %s865_s27 = sld [smem:[#allocation2 + $0x4]] }
  0x1b   :  { %v51_v3 = vstv %s50_s0  ;;  %s866_s28 = sld [smem:[#allocation2 + $0x5]] }
  0x1c   :  { %v52_v4 = vmul.f32 %v51_v3, %v40_v0  ;;  %v54_v5 = vstv %s857_s23  ;;  %s867_s29 = sld [smem:[#allocation2 + $0xa]] }
  0x1d   :  { %v55_v6 = vmul.f32 %v54_v5, %v42_v1  ;;  %v58_v7 = vstv %s858_s24  ;;  %s872_s1 = sld [smem:[#allocation2 + $0x6]] }
  0x1e   :  { %v59_v8 = vmul.f32 %v58_v7, %v44_v2  ;;  %s873_s30 = sld [smem:[#allocation2 + $0x7]]  ;;  %v62_v11 = vstv %s859_s25 }
  0x1f   :  { %v56_v9 = vadd.f32 %v55_v6, %v52_v4  ;;  %v168_v10 = vstv %s864_s26  ;;  %s874_s4 = sld [smem:[#allocation2 + $0x8]]  ;;  %v1046_v4 = vmov 1326507024  }
  0x20   :  { %v169_v12 = vmul.f32 %v168_v10, %v40_v0  ;;  %v171_v13 = vstv %s865_s27  ;;  %s875_s5 = sld [smem:[#allocation2 + $0xb]] }
  0x21   :  { %v60_v14 = vadd.f32 %v59_v8, %v56_v9  ;;  %v172_v15 = vmul.f32 %v171_v13, %v42_v1  ;;  %v175_v16 = vstv %s866_s28  ;;  %s1126_s6 = sld [smem:[#allocation2 + $0xc]] }
  0x22   :  { %v176_v17 = vmul.f32 %v175_v16, %v44_v2  ;;  %v179_v25 = vstv %s867_s29  ;;  %s1138_s7 = sld [smem:[#allocation2 + $0xd]] }
  0x23   :  { %v1077_v18 = vadd.f32 %v62_v11, %v60_v14  ;;  %v173_v19 = vadd.f32 %v172_v15, %v169_v12  ;;  %v285_v20 = vstv %s872_s1  ;;  %s1146_s8 = sld [smem:[#allocation2 + $0xe]] }
  0x24   :  { %v286_v21 = vmul.f32 %v285_v20, %v40_v0  ;;  %v288_v22 = vstv %s873_s30  ;;  %s1176_s13 = sld [smem:[#allocation2 + $0x15]] }
  0x25   :  { %v64_v23 = vand.u32 2147483647, %v1077_v18  ;;  %v67_v24 = vand.u32 2139095040, %v1077_v18  ;;  %v177_v26 = vadd.f32 %v176_v17, %v173_v19  ;;  %v289_v27 = vmul.f32 %v288_v22, %v42_v1  ;;  %s1247_s16 = sld [smem:[#allocation2 + $0x10]] }
  0x26   :  { %v292_v28 = vstv %s874_s4  ;;  %v296_v42 = vstv %s875_s5  ;;  %s1262_s17 = sld [smem:[#allocation2 + $0x11]] }
  0x27   :  { %v68_v29 = vshrl.u32 %v67_v24, 23  ;;  %v71_v30 = vand.u32 8388607, %v64_v23  ;;  %v1083_v31 = vadd.f32 %v179_v25, %v177_v26  ;;  %v290_v32 = vadd.f32 %v289_v27, %v286_v21  ;;  %s1275_s18 = sld [smem:[#allocation2 + $0x16]] }
  0x28   :  { %v293_v33 = vmul.f32 %v292_v28, %v44_v2  ;;  %s1331_s21 = sld [smem:[#allocation2 + $0x12]] }
  0x29   :  { %v860_v34 = vadd.s32 4294967169, %v68_v29  ;;  %v181_v35 = vand.u32 2147483647, %v1083_v31  ;;  %v184_v36 = vand.u32 2139095040, %v1083_v31  ;;  %v72_v38 = vor.u32 8388608, %v71_v30  ;;  %s1337_s22 = sld [smem:[#allocation2 + $0x13]] }
  0x2a   :  { %v294_v41 = vadd.f32 %v293_v33, %v290_v32  ;;  %s1379_s0 = sld [smem:[#allocation2 + $0x14]] }
  0x2b   :  { %v74_v37 = vadd.s32 1, %v860_v34  ;;  %v185_v39 = vshrl.u32 %v184_v36, 23  ;;  %v188_v40 = vand.u32 8388607, %v181_v35  ;;  %v1089_v48 = vshll.u32 %v72_v38, 8  ;;  %s1426_s23 = sld [smem:[#allocation2 + $0x17]] }
  0x2c   :  { %v1091_v50 = vadd.f32 %v296_v42, %v294_v41  ;;  %s1496_s24 = sld [smem:[#allocation2 + $0x18]] }
  0x2d   :  { %vm75_vm0 = vcmp.gt.s32.totalorder %v74_v37, 0  ;;  %v868_v44 = vadd.s32 4294967169, %v185_v39  ;;  %v189_v45 = vor.u32 8388608, %v188_v40  ;;  %s1503_s25 = sld [smem:[#allocation2 + $0x19]] }
  0x2e   :  { %v76_v43 = vsel %vm75_vm0, %v74_v37, 0  ;;  %v301_v29 = vand.u32 2139095040, %v1091_v50  ;;  %s1515_s26 = sld [smem:[#allocation2 + $0x1a]] }
  0x2f   :  { %v77_v46 = vshrl.u32 %v76_v43, 5  ;;  %v78_v47 = vand.u32 31, %v76_v43  ;;  %v191_v49 = vadd.s32 1, %v868_v44  ;;  %v1098_v62 = vshll.u32 %v189_v45, 8  ;;  %s1531_s27 = sld [smem:[#allocation2 + $0x21]] }
  0x30   :  { %s1533_s28 = sld [smem:[#allocation2 + $0x1b]] }
  0x31   :  { %v79_v51 = vsub.s32 32, %v78_v47  ;;  %v81_v53 = vshll.u32 %v1041_v52, %v78_v47  ;;  %v84_v55 = vshll.u32 %v1042_v54, %v78_v47  ;;  %v87_v57 = vshll.u32 %v1043_v56, %v78_v47  ;;  %s1540_s29 = sld [smem:[#allocation2 + $0x1c]] }
  0x32   :  { %v90_v59 = vshll.u32 %v1044_v58, %v78_v47  ;;  %v93_v61 = vshll.u32 %v1045_v60, %v78_v47  ;;  %vm96_vm1 = vcmp.lt.s32.totalorder %v77_v46, 1  ;;  %vm97_vm2 = vcmp.lt.s32.totalorder %v77_v46, 2  ;;  %s1575_s1 = sld [smem:[#allocation2 + $0x1d]] }
  0x33   :  { %v80_v63 = vshrl.u32 %v1041_v52, %v79_v51  ;;  %v82_v0 = vshrl.u32 %v1042_v54, %v79_v51  ;;  %v85_v1 = vshrl.u32 %v1043_v56, %v79_v51  ;;  %v88_v2 = vshrl.u32 %v1044_v58, %v79_v51  ;;  %s1579_s30 = sld [smem:[#allocation2 + $0x1e]] }
  0x34   :  { %v91_v3 = vshrl.u32 %v1045_v60, %v79_v51  ;;  %v94_v5 = vshrl.u32 %v1046_v4, %v79_v51  ;;  %vm99_vm3 = vcmp.lt.s32.totalorder %v77_v46, 4  ;;  %vm192_vm4 = vcmp.gt.s32.totalorder %v191_v49, 0  ;;  %s1581_s4 = sld [smem:[#allocation2 + $0x1f]] }
  0x35   :  { %v83_v6 = vor.u32 %v82_v0, %v81_v53  ;;  %v86_v7 = vor.u32 %v85_v1, %v84_v55  ;;  %v89_v8 = vor.u32 %v88_v2, %v87_v57  ;;  %vm98_vm5 = vcmp.lt.s32.totalorder %v77_v46, 3  ;;  %s1585_s5 = sld [smem:[#allocation2 + $0x20]] }
  0x36   :  { %v92_v9 = vor.u32 %v91_v3, %v90_v59  ;;  %v95_v10 = vor.u32 %v94_v5, %v93_v61  ;;  %v193_v11 = vsel %vm192_vm4, %v191_v49, 0  ;;  %v302_v59 = vshrl.u32 %v301_v29, 23  ;;  %s1691_s9 = sld [smem:[#allocation2 + $0x25]] }
  0x37   :  { %v100_v12 = vsel %vm96_vm1, %v80_v63, %v83_v6  ;;  %v101_v13 = vsel %vm99_vm3, %v89_v8, 2102212464  ;;  %v104_v14 = vsel %vm96_vm1, %v83_v6, %v86_v7  ;;  %v108_v15 = vsel %vm96_vm1, %v86_v7, %v89_v8  ;;  %s1693_s10 = sld [smem:[#allocation2 + $0x26]] }
  0x38   :  { %v102_v16 = vsel %vm98_vm5, %v86_v7, %v101_v13  ;;  %v105_v17 = vsel %vm99_vm3, %v92_v9, 920167782  ;;  %v109_v19 = vsel %vm99_vm3, %v95_v10, 1326507024  ;;  %v194_v20 = vshrl.u32 %v193_v11, 5  ;;  %s1695_s11 = sld [smem:[#allocation2 + $0x28]] }
  0x39   :  { %v103_v21 = vsel %vm97_vm2, %v100_v12, %v102_v16  ;;  %v106_v22 = vsel %vm98_vm5, %v89_v8, %v105_v17  ;;  %v110_v24 = vsel %vm98_vm5, %v92_v9, %v109_v19  ;;  %v195_v25 = vand.u32 31, %v193_v11  ;;  %s1699_s12 = sld [smem:[#allocation2 + $0x27]] }
  0x3a   :  { %v107_v26 = vsel %vm97_vm2, %v104_v14, %v106_v22  ;;  %v111_v27 = vsel %vm97_vm2, %v108_v15, %v110_v24  ;;  %v119_v28 = vmul.u32 %v1089_v48, %v103_v21  ;;  %vm213_vm6 = vcmp.lt.s32.totalorder %v194_v20, 1  ;;  %v1156_v15 = vld [vmem:[%s1718_s2] sm:$0x1]  ;;  %v1169_v22 = vld [vmem:[%s1718_s2 + $0x1] sm:$0x1]  ;;  %s907_s14 = sld [smem:[#allocation2 + $0x2a]] }
  0x3b   :  { %v1115_v30 = vmul.u32.u64.low %v1089_v48, %v111_v27  ;;  %v1116_v32 = vmul.u32.u64.high %v1089_v48, %v111_v27, %v1115_v30  ;;  %v1119_v33 = vmul.u32.u64.low %v1089_v48, %v107_v26  ;;  %v1120_v34 = vmul.u32.u64.high %v1089_v48, %v107_v26, %v1119_v33  ;;  %s911_s15 = sld [smem:[#allocation2 + $0x2b]] }
  0x3c   :  { %v196_v36 = vsub.s32 32, %v195_v25  ;;  %v198_v37 = vshll.u32 %v1041_v52, %v195_v25  ;;  %v201_v38 = vshll.u32 %v1042_v54, %v195_v25  ;;  %v204_v39 = vshll.u32 %v1043_v56, %v195_v25 }
  0x3d   :  { %v207_v40 = vshll.u32 %v1044_v58, %v195_v25  ;;  %v210_v41 = vshll.u32 %v1045_v60, %v195_v25  ;;  %vm214_vm7 = vcmp.lt.s32.totalorder %v194_v20, 2  ;;  %vm121_vm8 = vc.u32 %v1116_v32, %v1119_v33 }
  0x3e   :  { %v197_v42 = vshrl.u32 %v1041_v52, %v196_v36  ;;  %v199_v43 = vshrl.u32 %v1042_v54, %v196_v36  ;;  %v202_v44 = vshrl.u32 %v1043_v56, %v196_v36  ;;  %v205_v45 = vshrl.u32 %v1044_v58, %v196_v36 }
  0x3f   :  { %v122_v46 = vadd.s32 1, %v1120_v34  ;;  %v208_v47 = vshrl.u32 %v1045_v60, %v196_v36  ;;  %vm215_vm9 = vcmp.lt.s32.totalorder %v194_v20, 3  ;;  %v211_v53 = vshrl.u32 %v1046_v4, %v196_v36 }
  0x40   :  { %v200_v48 = vor.u32 %v199_v43, %v198_v37  ;;  %v203_v49 = vor.u32 %v202_v44, %v201_v38  ;;  %v206_v51 = vor.u32 %v205_v45, %v204_v39  ;;  %vm216_vm10 = vcmp.lt.s32.totalorder %v194_v20, 4  ;;  %v1186_v38 = vld [vmem:[%s1718_s2 + $0x2] sm:$0x1]  ;;  %s1241_s2 = sld [smem:[#allocation2 + $0xf]] }
  0x41   :  { %v123_v55 = vsel %vm121_vm8, %v122_v46, %v1120_v34  ;;  %v209_v57 = vor.u32 %v208_v47, %v207_v40  ;;  %v212_v63 = vor.u32 %v211_v53, %v210_v41  ;;  %v402_v10 = vstv %s1126_s6  ;;  %s1590_s6 = sld [smem:[#allocation2 + $0x22]] }
  0x42   :  { %v124_v61 = vadd.s32 %v123_v55, %v119_v28  ;;  %v217_v0 = vsel %vm213_vm6, %v197_v42, %v200_v48  ;;  %v218_v1 = vsel %vm216_vm10, %v206_v51, 2102212464  ;;  %v221_v3 = vsel %vm213_vm6, %v200_v48, %v203_v49 }
  0x43   :  { %v219_v2 = vsel %vm215_vm9, %v203_v49, %v218_v1  ;;  %v222_v5 = vsel %vm216_vm10, %v209_v57, 920167782  ;;  %v225_v6 = vsel %vm213_vm6, %v203_v49, %v206_v51  ;;  %v226_v9 = vsel %vm216_vm10, %v212_v63, 1326507024 }
  0x44   :  { %v125_v7 = vadd.s32 536870912, %v124_v61  ;;  %v223_v8 = vsel %vm215_vm9, %v206_v51, %v222_v5  ;;  %v220_v11 = vsel %vm214_vm7, %v217_v0, %v219_v2  ;;  %v227_v13 = vsel %vm215_vm9, %v209_v57, %v226_v9 }
  0x45   :  { %v224_v12 = vsel %vm214_vm7, %v221_v3, %v223_v8  ;;  %v876_v14 = vadd.s32 4294967169, %v302_v59  ;;  %v228_v17 = vsel %vm214_vm7, %v225_v6, %v227_v13  ;;  %v405_v27 = vstv %s1138_s7  ;;  %s1612_s7 = sld [smem:[#allocation2 + $0x23]] }
  0x46   :  { %v1158_v16 = vshrl.u32 %v125_v7, 30  ;;  %v1162_v19 = vmul.u32.u64.low %v1098_v62, %v224_v12  ;;  %v1163_v21 = vmul.u32.u64.high %v1098_v62, %v224_v12, %v1162_v19  ;;  %v236_v28 = vmul.u32 %v1098_v62, %v220_v11 }
  0x47   :  { %v1172_v24 = vmul.u32.u64.low %v1098_v62, %v228_v17  ;;  %v1173_v25 = vmul.u32.u64.high %v1098_v62, %v228_v17, %v1172_v24  ;;  %v308_v26 = vadd.s32 1, %v876_v14  ;;  %v403_v29 = vmul.f32 %v402_v10, %v1156_v15 }
  0x48   :  { %v127_v20 = vshll.u32 %v1158_v16, 30  ;;  %v239_v34 = vadd.s32 1, %v1163_v21  ;;  %v406_v37 = vmul.f32 %v1169_v22, %v405_v27  ;;  %v409_v39 = vstv %s1146_s8  ;;  %s1689_s8 = sld [smem:[#allocation2 + $0x24]] }
  0x49   :  { %vm309_vm11 = vcmp.gt.s32.totalorder %v308_v26, 0  ;;  %vm238_vm12 = vc.u32 %v1173_v25, %v1162_v19  ;;  %v298_v41 = vand.u32 2147483647, %v1091_v50  ;;  %v410_v46 = vmul.f32 %v1186_v38, %v409_v39 }
  0x4a   :  { %v128_v30 = vsub.s32 %v124_v61, %v127_v20  ;;  %v310_v36 = vsel %vm309_vm11, %v308_v26, 0  ;;  %v240_v40 = vsel %vm238_vm12, %v239_v34, %v1163_v21  ;;  %v407_v45 = vadd.f32 %v406_v37, %v403_v29 }
  0x4b   :  { %v312_v42 = vand.u32 31, %v310_v36  ;;  %v241_v43 = vadd.s32 %v240_v40, %v236_v28  ;;  %v120_v47 = vadd.s32 %v1119_v33, %v1116_v32  ;;  %v413_v51 = vstv %s1176_s13  ;;  %s1701_s13 = sld [smem:[#allocation2 + $0x29]] }
  0x4c   :  { %v130_v62 = vsub.s32 0, %v128_v30  ;;  %v305_v55 = vand.u32 8388607, %v298_v41  ;;  %v1199_v57 = vshrl.u32 %v310_v36, 5  ;;  %v411_v10 = vadd.f32 %v410_v46, %v407_v45 }
  0x4d   :  { %v242_v48 = vadd.s32 536870912, %v241_v43  ;;  %v313_v49 = vsub.s32 32, %v312_v42  ;;  %v315_v59 = vshll.u32 %v1041_v52, %v312_v42  ;;  %v318_v0 = vshll.u32 %v1042_v54, %v312_v42 }
  0x4e   :  { %v861_v44 = vmin.u32 %v130_v62, %v128_v30  ;;  %v321_v33 = vshll.u32 %v1043_v56, %v312_v42  ;;  %v324_v2 = vshll.u32 %v1044_v58, %v312_v42  ;;  %v327_v7 = vshll.u32 %v1045_v60, %v312_v42 }
  0x4f   :  { %v1202_v61 = vshrl.u32 %v242_v48, 30  ;;  %v316_v63 = vshrl.u32 %v1042_v54, %v313_v49  ;;  %v319_v1 = vshrl.u32 %v1043_v56, %v313_v49  ;;  %v325_v3 = vshrl.u32 %v1045_v60, %v313_v49 }
  0x50   :  { %v132_v53 = vclz %v861_v44  ;;  %v322_v6 = vshrl.u32 %v1044_v58, %v313_v49  ;;  %v328_v8 = vshrl.u32 %v1046_v4, %v313_v49  ;;  %v314_v9 = vshrl.u32 %v1041_v52, %v313_v49 }
  0x51   :  { %v244_v5 = vshll.u32 %v1202_v61, 30  ;;  %vm330_vm14 = vcmp.lt.s32.totalorder %v1199_v57, 1  ;;  %v317_v13 = vor.u32 %v316_v63, %v315_v59  ;;  %v320_v14 = vor.u32 %v319_v1, %v318_v0 }
  0x52   :  { %v862_v32 = vadd.s32 4294967294, %v132_v53  ;;  %v326_v26 = vor.u32 %v325_v3, %v324_v2  ;;  %v323_v20 = vor.u32 %v322_v6, %v321_v33  ;;  %v329_v28 = vor.u32 %v328_v8, %v327_v7 }
  0x53   :  { %v1216_v12 = vsub.s32 %v241_v43, %v244_v5  ;;  %vm333_vm15 = vcmp.lt.s32.totalorder %v1199_v57, 4  ;;  %v306_v36 = vor.u32 8388608, %v305_v55  ;;  %vm332_vm0 = vcmp.lt.s32.totalorder %v1199_v57, 3 }
  0x54   :  { %vm863_vm13 = vcmp.lt.s32.totalorder %v862_v32, 0  ;;  %vm331_vm1 = vcmp.lt.s32.totalorder %v1199_v57, 2  ;;  %v335_v39 = vsel %vm333_vm15, %v323_v20, 2102212464  ;;  %v338_v42 = vsel %vm330_vm14, %v317_v13, %v320_v14 }
  0x55   :  { %v135_v11 = vsel %vm863_vm13, 0, %v862_v32  ;;  %v247_v27 = vsub.s32 0, %v1216_v12  ;;  %v339_v43 = vsel %vm333_vm15, %v326_v26, 920167782  ;;  %v342_v46 = vsel %vm330_vm14, %v320_v14, %v323_v20 }
  0x56   :  { %v136_v17 = vsub.s32 32, %v135_v11  ;;  %v137_v21 = vshll.u32 %v128_v30, %v135_v11  ;;  %v140_v24 = vsub.s32 4294967266, %v135_v11  ;;  %v334_v30 = vsel %vm330_vm14, %v314_v9, %v317_v13 }
  0x57   :  { %v869_v37 = vmin.u32 %v247_v27, %v1216_v12  ;;  %v340_v45 = vsel %vm332_vm0, %v323_v20, %v339_v43  ;;  %v336_v53 = vsel %vm332_vm0, %v320_v14, %v335_v39  ;;  %v346_v1 = vshll.u32 %v306_v36, 8 }
  0x58   :  { %v138_v29 = vshrl.u32 %v120_v47, %v136_v17  ;;  %v141_v34 = vadd.s32 127, %v140_v24  ;;  %v343_v47 = vsel %vm333_vm15, %v329_v28, 1326507024  ;;  %v341_v63 = vsel %vm331_vm1, %v338_v42, %v340_v45 }
  0x59   :  { %v249_v44 = vclz %v869_v37  ;;  %v344_v55 = vsel %vm332_vm0, %v326_v26, %v343_v47  ;;  %v1249_v33 = vadd.f32 %v413_v51, %v411_v10  ;;  %v237_v2 = vadd.s32 %v1162_v19, %v1173_v25 }
  0x5a   :  { %v139_v62 = vor.u32 %v138_v29, %v137_v21  ;;  %v142_v40 = vshll.u32 %v141_v34, 23  ;;  %v345_v0 = vsel %vm331_vm1, %v342_v46, %v344_v55  ;;  %v337_v7 = vsel %vm331_vm1, %v334_v30, %v336_v53 }
  0x5b   :  { %v870_v59 = vadd.s32 4294967294, %v249_v44  ;;  %v1253_v3 = vmul.u32.u64.low %v346_v1, %v345_v0  ;;  %v1254_v5 = vmul.u32.u64.high %v346_v1, %v345_v0, %v1253_v3  ;;  %v418_v25 = vand.u32 2139095040, %v1249_v33 }
  0x5c   :  { %v143_v48 = vor.u32 4788187, %v142_v40  ;;  %v146_v49 = vcvt.s32.f32 %v139_v62  ;;  %v1258_v8 = vmul.u32.u64.low %v346_v1, %v341_v63  ;;  %v1259_v9 = vmul.u32.u64.high %v346_v1, %v341_v63, %v1258_v8 }
  0x5d   :  { %vm871_vm2 = vcmp.lt.s32.totalorder %v870_v59, 0  ;;  %v353_v17 = vmul.u32 %v346_v1, %v337_v7  ;;  %v150_v57 = vsub.s32 4, %v1158_v16  ;;  %v419_v24 = vshrl.u32 %v418_v25, 23 }
  0x5e   :  { %v144_v32 = vand.u32 2147483647, %v143_v48  ;;  %v252_v6 = vsel %vm871_vm2, 0, %v870_v59  ;;  %vm355_vm3 = vc.u32 %v1254_v5, %v1258_v8  ;;  %v356_v21 = vadd.s32 1, %v1259_v9 }
  0x5f   :  { %v253_v51 = vsub.s32 32, %v252_v6  ;;  %v257_v10 = vsub.s32 4294967266, %v252_v6  ;;  %v254_v19 = vshll.u32 %v1216_v12, %v252_v6  ;;  %v519_v20 = vstv %s1241_s2  ;;  %s1047_s2 = smov [#allocation7]  }
  0x60   :  { %v147_v11 = vmul.f32 %v146_v49, %v144_v32  ;;  %v522_v28 = vstv %s1247_s16  ;;  %vm66_vm4 = vcmp.lt.s32.totalorder %v1077_v18, 0  ;;  %v357_v29 = vsel %vm355_vm3, %v356_v21, %v1259_v9  ;;  %s842_s16 = sshll.u32 %s1047_s2, 4  ;;  %s843_s16 = int_to_ptr.vmem [resolvable:$true] %s842_s16 }
  0x61   :  { %v255_v13 = vshrl.u32 %v237_v2, %v253_v51  ;;  %v258_v14 = vadd.s32 127, %v257_v10  ;;  %v884_v34 = vadd.s32 4294967169, %v419_v24  ;;  %v358_v37 = vadd.s32 %v357_v29, %v353_v17  ;;  %p1016_p6 = scmp.lt.s32.totalorder %s843_s16, %s843_s16 }
  0x62   :  { %v148_v26 = vxor.u32 2147483648, %v147_v11  ;;  %v415_v30 = vand.u32 2147483647, %v1249_v33  ;;  %v151_v39 = vsel %vm66_vm4, %v150_v57, %v1158_v16  ;;  %v520_v40 = vmul.f32 %v519_v20, %v1156_v15 }
  0x63   :  { %v259_v27 = vshll.u32 %v258_v14, 23  ;;  %v256_v12 = vor.u32 %v255_v13, %v254_v19  ;;  %v425_v62 = vadd.s32 1, %v884_v34  ;;  %v523_v42 = vmul.f32 %v1169_v22, %v522_v28 }
  0x64   :  { %vm1282_vm5 = vcmp.le.f32.partialorder %v64_v23, 0.7853982  ;;  %v149_v44 = vsel %vm66_vm4, %v148_v26, %v147_v11  ;;  %v359_v45 = vadd.s32 536870912, %v358_v37  ;;  %v526_v46 = vstv %s1262_s17  ;;  %s1011_s17 = scalar_lea.vmem %s843_s16, 80 }
  0x65   :  { %v260_v36 = vor.u32 4788187, %v259_v27  ;;  %v263_v48 = vcvt.s32.f32 %v256_v12  ;;  %vm426_vm6 = vcmp.gt.s32.totalorder %v425_v62, 0  ;;  %v153_v16 = vsel %vm1282_vm5, 0, %v151_v39  ;;  %p1012_p5 = scmp.ne.s32.totalorder %s843_s16, %s1011_s17 }
  0x66   :  { %v1289_v49 = vshrl.u32 %v359_v45, 30  ;;  %v422_v53 = vand.u32 8388607, %v415_v30  ;;  %v427_v55 = vsel %vm426_vm6, %v425_v62, 0  ;;  %v152_v23 = vsel %vm1282_vm5, %v1077_v18, %v149_v44 }
  0x67   :  { %v261_v47 = vand.u32 2147483647, %v260_v36  ;;  %v429_v59 = vand.u32 31, %v427_v55  ;;  %v524_v63 = vadd.f32 %v523_v42, %v520_v40  ;;  %v527_v0 = vmul.f32 %v1186_v38, %v526_v46 }
  0x68   :  { %vm183_vm7 = vcmp.lt.s32.totalorder %v1083_v31, 0  ;;  %v361_v1 = vshll.u32 %v1289_v49, 30  ;;  %v1299_v32 = vand.u32 3, %v153_v16  ;;  %vm1303_vm8 = vcmp.le.f32.partialorder %v181_v35, 0.7853982 }
  0x69   :  { %v264_v3 = vmul.f32 %v263_v48, %v261_v47  ;;  %v430_v6 = vsub.s32 32, %v429_v59  ;;  %959 = vcosq.f32 %v152_v23  ;;  %v423_v9 = vor.u32 8388608, %v422_v53 }
  0x6a   :  { %v1307_v7 = vsub.s32 %v358_v37, %v361_v1  ;;  %v530_v11 = vstv %s1275_s18  ;;  %v432_v51 = vshll.u32 %v1041_v52, %v429_v59  ;;  %v435_v19 = vshll.u32 %v1042_v54, %v429_v59  ;;  %s1015_s18 = scalar_lea.vmem %s843_s16, 96 }
  0x6b   :  { %v433_v10 = vshrl.u32 %v1042_v54, %v430_v6  ;;  %v528_v25 = vadd.f32 %v527_v0, %v524_v63  ;;  %v1314_v35 = vshrl.u32 %v427_v55, 5  ;;  %v436_v14 = vshrl.u32 %v1043_v56, %v430_v6  ;;  %p1017_p7 = scmp.lt.s32.totalorder %s1015_s18, %s1011_s17 }
  0x6c   :  { %v364_v13 = vsub.s32 0, %v1307_v7  ;;  %v441_v17 = vshll.u32 %v1044_v58, %v429_v59  ;;  %v265_v57 = vxor.u32 2147483648, %v264_v3  ;;  %v438_v21 = vshll.u32 %v1043_v56, %v429_v59 }
  0x6d   :  { %v439_v24 = vshrl.u32 %v1044_v58, %v430_v6  ;;  %v442_v26 = vshrl.u32 %v1045_v60, %v430_v6  ;;  %961 = vsinq.f32 %v152_v23  ;;  %v267_v27 = vsub.s32 4, %v1202_v61  ;;  %p1018_p8 = por %p1017_p7, %p1016_p6 }
  0x6e   :  { %v354_v20 = vadd.s32 %v1258_v8, %v1254_v5  ;;  %v877_v28 = vmin.u32 %v364_v13, %v1307_v7  ;;  %v434_v12 = vor.u32 %v433_v10, %v432_v51  ;;  %v437_v29 = vor.u32 %v436_v14, %v435_v19 }
  0x6f   :  { %v1325_v34 = vshll.u32 %v423_v9, 8  ;;  %v1327_v36 = vadd.f32 %v530_v11, %v528_v25  ;;  %v443_v39 = vor.u32 %v442_v26, %v441_v17  ;;  %v444_v62 = vshll.u32 %v1045_v60, %v429_v59  ;;  %p1019_p9 = pnand %p1018_p8, %p1012_p5 }
  0x70   :  { %v366_v37 = vclz %v877_v28  ;;  %v445_v40 = vshrl.u32 %v1046_v4, %v430_v6  ;;  %v266_v42 = vsel %vm183_vm7, %v265_v57, %v264_v3  ;;  %v431_v5 = vshrl.u32 %v1041_v52, %v430_v6 }
  0x71   :  { %v440_v8 = vor.u32 %v439_v24, %v438_v21  ;;  %vm447_vm9 = vcmp.lt.s32.totalorder %v1314_v35, 1  ;;  %vm300_vm10 = vcmp.lt.s32.totalorder %v1091_v50, 0  ;;  %v384_v44 = vsub.s32 4, %v1289_v49 }
  0x72   :  { %v878_v43 = vadd.s32 4294967294, %v366_v37  ;;  %vm449_vm11 = vcmp.lt.s32.totalorder %v1314_v35, 3  ;;  %vm450_vm12 = vcmp.lt.s32.totalorder %v1314_v35, 4  ;;  %v446_v45 = vor.u32 %v445_v40, %v444_v62 }
  0x73   :  { %vm448_vm13 = vcmp.lt.s32.totalorder %v1314_v35, 2  ;;  %v455_v46 = vsel %vm447_vm9, %v434_v12, %v437_v29  ;;  %v535_v47 = vand.u32 2139095040, %v1327_v36  ;;  %v269_v48 = vsel %vm1303_vm8, %v1083_v31, %v266_v42 }
  0x74   :  { %vm879_vm14 = vcmp.lt.s32.totalorder %v878_v43, 0  ;;  %v452_v16 = vsel %vm450_vm12, %v440_v8, 2102212464  ;;  %v456_v53 = vsel %vm450_vm12, %v443_v39, 920167782  ;;  %v451_v23 = vsel %vm447_vm9, %v431_v5, %v434_v12 }
  0x75   :  { %v369_v55 = vsel %vm879_vm14, 0, %v878_v43  ;;  %v457_v59 = vsel %vm449_vm11, %v440_v8, %v456_v53  ;;  %v459_v63 = vsel %vm447_vm9, %v437_v29, %v440_v8  ;;  %v453_v11 = vsel %vm449_vm11, %v437_v29, %v452_v16 }
  0x76   :  { %v370_v0 = vsub.s32 32, %v369_v55  ;;  %v371_v1 = vshll.u32 %v1307_v7, %v369_v55  ;;  %v374_v3 = vsub.s32 4294967266, %v369_v55  ;;  %v458_v6 = vsel %vm448_vm13, %v455_v46, %v457_v59  ;;  %v1363_v9 = vpop.eup %959 }
  0x77   :  { %v460_v51 = vsel %vm450_vm12, %v446_v45, 1326507024  ;;  %v1370_v10 = vmul.u32.u64.low %v1325_v34, %v458_v6  ;;  %v1371_v19 = vmul.u32.u64.high %v1325_v34, %v458_v6, %v1370_v10  ;;  %v268_v7 = vsel %vm183_vm7, %v267_v27, %v1202_v61 }
  0x78   :  { %v372_v25 = vshrl.u32 %v354_v20, %v370_v0  ;;  %v375_v13 = vadd.s32 127, %v374_v3  ;;  %v461_v14 = vsel %vm449_vm11, %v443_v39, %v460_v51  ;;  %v536_v57 = vshrl.u32 %v535_v47, 23 }
  0x79   :  { %v462_v17 = vsel %vm448_vm13, %v459_v63, %v461_v14  ;;  %v636_v21 = vstv %s1331_s21  ;;  %v639_v24 = vstv %s1337_s22  ;;  %963 = vcosq.f32 %v269_v48 }
  0x7a   :  { %v373_v26 = vor.u32 %v372_v25, %v371_v1  ;;  %v376_v28 = vshll.u32 %v375_v13, 23  ;;  %v454_v12 = vsel %vm448_vm13, %v451_v23, %v453_v11  ;;  %v1387_v61 = vpop.eup %961  ;;  %965 = vsinq.f32 %v269_v48 }
  0x7b   :  { %v385_v27 = vsel %vm300_vm10, %v384_v44, %v1289_v49  ;;  %v1393_v20 = vmul.u32.u64.low %v1325_v34, %v462_v17  ;;  %v1394_v29 = vmul.u32.u64.high %v1325_v34, %v462_v17, %v1393_v20  ;;  %v473_v62 = vadd.s32 1, %v1371_v19 }
  0x7c   :  { %v377_v37 = vor.u32 4788187, %v376_v28  ;;  %v380_v39 = vcvt.s32.f32 %v373_v26  ;;  %v892_v40 = vadd.s32 4294967169, %v536_v57  ;;  %vm162_vm15 = vcmp.eq.s32.totalorder %v1299_v32, 2 }
  0x7d   :  { %vm1400_vm0 = vcmp.le.f32.partialorder %v298_v41, 0.7853982  ;;  %v470_v49 = vmul.u32 %v1325_v34, %v454_v12  ;;  %v270_v42 = vsel %vm1303_vm8, 0, %v268_v7  ;;  %vm159_vm1 = vcmp.eq.s32.totalorder %v1299_v32, 0 }
  0x7e   :  { %v378_v5 = vand.u32 2147483647, %v377_v37  ;;  %v387_v8 = vsel %vm1400_vm0, 0, %v385_v27  ;;  %v542_v43 = vadd.s32 1, %v892_v40  ;;  %vm472_vm2 = vc.u32 %v1394_v29, %v1370_v10 }
  0x7f   :  { %v532_v41 = vand.u32 2147483647, %v1327_v36  ;;  %v637_v44 = vmul.f32 %v636_v21, %v1156_v15  ;;  %v640_v45 = vmul.f32 %v1169_v22, %v639_v24  ;;  %v474_v2 = vsel %vm472_vm2, %v473_v62, %v1371_v19 }
  0x80   :  { %v381_v34 = vmul.f32 %v380_v39, %v378_v5  ;;  %vm543_vm3 = vcmp.gt.s32.totalorder %v542_v43, 0  ;;  %v643_v46 = vstv %s1379_s0  ;;  %v1417_v47 = vand.u32 3, %v270_v42 }
  0x81   :  { %v1419_v48 = vand.u32 3, %v387_v8  ;;  %v475_v16 = vadd.s32 %v474_v2, %v470_v49  ;;  %v544_v53 = vsel %vm543_vm3, %v542_v43, 0  ;;  %v160_v55 = vxor.u32 2147483648, %v1387_v61 }
  0x82   :  { %v163_v23 = vxor.u32 2147483648, %v1363_v9  ;;  %v382_v59 = vxor.u32 2147483648, %v381_v34  ;;  %v546_v63 = vand.u32 31, %v544_v53  ;;  %v539_v22 = vand.u32 8388607, %v532_v41 }
  0x83   :  { %v476_v15 = vadd.s32 536870912, %v475_v16  ;;  %v641_v0 = vadd.f32 %v640_v45, %v637_v44  ;;  %v644_v1 = vmul.f32 %v1186_v38, %v643_v46  ;;  %v1430_v6 = vshrl.u32 %v544_v53, 5 }
  0x84   :  { %v383_v3 = vsel %vm300_vm10, %v382_v59, %v381_v34  ;;  %v547_v11 = vsub.s32 32, %v546_v63  ;;  %v549_v51 = vshll.u32 %v1041_v52, %v546_v63  ;;  %vm276_vm4 = vcmp.eq.s32.totalorder %v1417_v47, 0 }
  0x85   :  { %vm279_vm5 = vcmp.eq.s32.totalorder %v1417_v47, 2  ;;  %v386_v19 = vsel %vm1400_vm0, %v1091_v50, %v383_v3  ;;  %v1438_v7 = vshrl.u32 %v476_v15, 30  ;;  %v552_v38 = vshll.u32 %v1042_v54, %v546_v63 }
  0x86   :  { %v555_v25 = vshll.u32 %v1043_v56, %v546_v63  ;;  %967 = vcosq.f32 %v386_v19  ;;  %v550_v13 = vshrl.u32 %v1042_v54, %v547_v11  ;;  %v553_v14 = vshrl.u32 %v1043_v56, %v547_v11  ;;  %v964_v57 = vpop.eup %963 }
  0x87   :  { %v558_v17 = vshll.u32 %v1044_v58, %v546_v63  ;;  %vm158_vm6 = vcmp.lt.s32.totalorder %v1299_v32, 2  ;;  %v164_v21 = vsel %vm162_vm15, %v163_v23, %v1387_v61  ;;  %969 = vsinq.f32 %v386_v19  ;;  %v966_v28 = vpop.eup %965 }
  0x88   :  { %v478_v24 = vshll.u32 %v1438_v7, 30  ;;  %v556_v26 = vshrl.u32 %v1044_v58, %v547_v11  ;;  %vm275_vm7 = vcmp.lt.s32.totalorder %v1417_v47, 2  ;;  %v540_v12 = vor.u32 8388608, %v539_v22 }
  0x89   :  { %v551_v27 = vor.u32 %v550_v13, %v549_v51  ;;  %v559_v20 = vshrl.u32 %v1045_v60, %v547_v11  ;;  %v561_v37 = vshll.u32 %v1045_v60, %v546_v63  ;;  %v554_v62 = vor.u32 %v553_v14, %v552_v38 }
  0x8a   :  { %v1454_v39 = vsub.s32 %v475_v16, %v478_v24  ;;  %v557_v40 = vor.u32 %v556_v26, %v555_v25  ;;  %v562_v61 = vshrl.u32 %v1046_v4, %v547_v11  ;;  %v161_v35 = vsel %vm159_vm1, %v1363_v9, %v160_v55 }
  0x8b   :  { %v560_v49 = vor.u32 %v559_v20, %v558_v17  ;;  %vm564_vm8 = vcmp.lt.s32.totalorder %v1430_v6, 1  ;;  %v645_v42 = vadd.f32 %v644_v1, %v641_v0  ;;  %v280_v5 = vxor.u32 2147483648, %v964_v57 }
  0x8c   :  { %v548_v8 = vshrl.u32 %v1041_v52, %v547_v11  ;;  %v563_v43 = vor.u32 %v562_v61, %v561_v37  ;;  %v647_v44 = vstv %s1426_s23  ;;  %v277_v45 = vxor.u32 2147483648, %v966_v28 }
  0x8d   :  { %vm566_vm9 = vcmp.lt.s32.totalorder %v1430_v6, 3  ;;  %vm567_vm10 = vcmp.lt.s32.totalorder %v1430_v6, 4  ;;  %v580_v34 = vshll.u32 %v540_v12, 8  ;;  %v481_v2 = vsub.s32 0, %v1454_v39 }
  0x8e   :  { %vm565_vm11 = vcmp.lt.s32.totalorder %v1430_v6, 2  ;;  %v572_v9 = vsel %vm564_vm8, %v551_v27, %v554_v62  ;;  %v576_v46 = vsel %vm564_vm8, %v554_v62, %v557_v40  ;;  %v569_v16 = vsel %vm567_vm10, %v557_v40, 2102212464 }
  0x8f   :  { %v573_v53 = vsel %vm567_vm10, %v560_v49, 920167782  ;;  %v577_v55 = vsel %vm567_vm10, %v563_v43, 1326507024  ;;  %v1471_v23 = vadd.f32 %v647_v44, %v645_v42  ;;  %v568_v59 = vsel %vm564_vm8, %v548_v8, %v551_v27 }
  0x90   :  { %v570_v63 = vsel %vm566_vm9, %v554_v62, %v569_v16  ;;  %v574_v15 = vsel %vm566_vm9, %v557_v40, %v573_v53  ;;  %v578_v22 = vsel %vm566_vm9, %v560_v49, %v577_v55  ;;  %v278_v0 = vsel %vm276_vm4, %v964_v57, %v277_v45 }
  0x91   :  { %v281_v1 = vsel %vm279_vm5, %v280_v5, %v966_v28  ;;  %v575_v3 = vsel %vm565_vm11, %v572_v9, %v574_v15  ;;  %v579_v11 = vsel %vm565_vm11, %v576_v46, %v578_v22  ;;  %vm156_vm12 = vweird.f32 %v1077_v18 }
  0x92   :  { %v885_v51 = vmin.u32 %v481_v2, %v1454_v39  ;;  %v1485_v19 = vmul.u32.u64.low %v580_v34, %v579_v11  ;;  %v1486_v38 = vmul.u32.u64.high %v580_v34, %v579_v11, %v1485_v19  ;;  %v165_v25 = vsel %vm158_vm6, %v161_v35, %v164_v21 }
  0x93   :  { %v571_v13 = vsel %vm565_vm11, %v568_v59, %v570_v63  ;;  %v1492_v14 = vmul.u32.u64.low %v580_v34, %v575_v3  ;;  %v1493_v17 = vmul.u32.u64.high %v580_v34, %v575_v3, %v1492_v14  ;;  %v968_v57 = vpop.eup %967  ;;  %vm273_vm13 = vweird.f32 %v1083_v31 }
  0x94   :  { %v282_v24 = vsel %vm275_vm7, %v278_v0, %v281_v1  ;;  %vm396_vm14 = vcmp.eq.s32.totalorder %v1419_v48, 2  ;;  %v652_v32 = vand.u32 2139095040, %v1471_v23  ;;  %v970_v6 = vpop.eup %969  ;;  %vm390_vm15 = vweird.f32 %v1091_v50 }
  0x95   :  { %vm392_vm0 = vcmp.lt.s32.totalorder %v1419_v48, 2  ;;  %vm393_vm1 = vcmp.eq.s32.totalorder %v1419_v48, 0  ;;  %v397_v21 = vxor.u32 2147483648, %v968_v57  ;;  %v166_v26 = vsel %vm156_vm12, nan, %v165_v25 }
  0x96   :  { %v394_v28 = vxor.u32 2147483648, %v970_v6  ;;  %v483_v47 = vclz %v885_v51  ;;  %v587_v12 = vmul.u32 %v580_v34, %v571_v13  ;;  %v283_v27 = vsel %vm273_vm13, nan, %v282_v24 }
  0x97   :  { %v398_v20 = vsel %vm396_vm14, %v397_v21, %v970_v6  ;;  %vm589_vm2 = vc.u32 %v1486_v38, %v1492_v14  ;;  %v590_v37 = vadd.s32 1, %v1493_v17  ;;  %v649_v18 = vand.u32 2147483647, %v1471_v23 }
  0x98   :  { %v395_v62 = vsel %vm393_vm1, %v968_v57, %v394_v28  ;;  %v653_v40 = vshrl.u32 %v652_v32, 23  ;;  %v886_v49 = vadd.s32 4294967294, %v483_v47  ;;  %v1523_v5 = vmul.f32 %v283_v27, %v166_v26 }
  0x99   :  { %v399_v61 = vsel %vm392_vm0, %v395_v62, %v398_v20  ;;  %v591_v31 = vsel %vm589_vm2, %v590_v37, %v1493_v17  ;;  %v656_v45 = vand.u32 8388607, %v649_v18  ;;  %v790_v34 = vstv %s1496_s24 }
  0x9a   :  { %v400_v35 = vsel %vm390_vm15, nan, %v399_v61  ;;  %v592_v42 = vadd.s32 %v591_v31, %v587_v12  ;;  %v900_v8 = vadd.s32 4294967169, %v653_v40  ;;  %v793_v48 = vstv %s1503_s25 }
  0x9b   :  { %v1525_v43 = vmul.f32 %v400_v35, %v283_v27  ;;  %vm887_vm3 = vcmp.lt.s32.totalorder %v886_v49, 0  ;;  %v1538_v9 = vmul.f32 %v1523_v5, %v400_v35  ;;  %v794_v16 = vmul.f32 %v793_v48, %v1523_v5 }
  0x9c   :  { %v593_v44 = vadd.s32 536870912, %v592_v42  ;;  %v659_v2 = vadd.s32 1, %v900_v8  ;;  %v797_v53 = vstv %s1515_s26  ;;  %v657_v59 = vor.u32 8388608, %v656_v45 }
  0x9d   :  { %v791_v46 = vmul.f32 %v790_v34, %v1525_v43  ;;  %v1546_v15 = vsel %vm887_vm3, 0, %v886_v49  ;;  %v1550_v0 = vadd.s32 %v1370_v10, %v1394_v29  ;;  %v798_v11 = vmul.f32 %v797_v53, %v1538_v9 }
  0x9e   :  { %v1535_v50 = vshrl.u32 %v593_v44, 30  ;;  %vm660_vm4 = vcmp.gt.s32.totalorder %v659_v2, 0  ;;  %v487_v1 = vsub.s32 32, %v1546_v15  ;;  %v488_v17 = vshll.u32 %v1454_v39, %v1546_v15 }
  0x9f   :  { %v661_v63 = vsel %vm660_vm4, %v659_v2, 0  ;;  %v795_v13 = vadd.f32 %v794_v16, %v791_v46  ;;  %v491_v10 = vsub.s32 4294967266, %v1546_v15  ;;  %v1562_v57 = vshll.u32 %v657_v59, 8 }
  0xa0   :  { %v595_v55 = vshll.u32 %v1535_v50, 30  ;;  %v663_v22 = vand.u32 31, %v661_v63  ;;  %v662_v24 = vshrl.u32 %v661_v63, 5  ;;  %v801_v21 = vstv %s1531_s27 }
  0xa1   :  { %v806_v47 = vstv %s1533_s28  ;;  %v809_v12 = vstv %s1540_s29  ;;  %v799_v62 = vadd.f32 %v798_v11, %v795_v13  ;;  %v492_v16 = vadd.s32 127, %v491_v10 }
  0xa2   :  { %v1553_v3 = vsub.s32 %v592_v42, %v595_v55  ;;  %v664_v51 = vsub.s32 32, %v663_v22  ;;  %v666_v19 = vshll.u32 %v1041_v52, %v663_v22  ;;  %v669_v25 = vshll.u32 %v1042_v54, %v663_v22 }
  0xa3   :  { %v672_v28 = vshll.u32 %v1043_v56, %v663_v22  ;;  %v675_v31 = vshll.u32 %v1044_v58, %v663_v22  ;;  %v678_v35 = vshll.u32 %v1045_v60, %v663_v22  ;;  %vm681_vm5 = vcmp.lt.s32.totalorder %v662_v24, 1 }
  0xa4   :  { %v598_v29 = vsub.s32 0, %v1553_v3  ;;  %v667_v32 = vshrl.u32 %v1042_v54, %v664_v51  ;;  %v670_v6 = vshrl.u32 %v1043_v56, %v664_v51  ;;  %v665_v27 = vshrl.u32 %v1041_v52, %v664_v51 }
  0xa5   :  { %v673_v61 = vshrl.u32 %v1044_v58, %v664_v51  ;;  %v676_v54 = vshrl.u32 %v1045_v60, %v664_v51  ;;  %v679_v56 = vshrl.u32 %v1046_v4, %v664_v51  ;;  %vm682_vm6 = vcmp.lt.s32.totalorder %v662_v24, 2 }
  0xa6   :  { %v893_v26 = vmin.u32 %v598_v29, %v1553_v3  ;;  %v668_v20 = vor.u32 %v667_v32, %v666_v19  ;;  %v671_v37 = vor.u32 %v670_v6, %v669_v25  ;;  %vm683_vm7 = vcmp.lt.s32.totalorder %v662_v24, 3 }
  0xa7   :  { %v674_v49 = vor.u32 %v673_v61, %v672_v28  ;;  %v677_v42 = vor.u32 %v676_v54, %v675_v31  ;;  %v680_v8 = vor.u32 %v679_v56, %v678_v35  ;;  %vm684_vm8 = vcmp.lt.s32.totalorder %v662_v24, 4 }
  0xa8   :  { %v600_v40 = vclz %v893_v26  ;;  %v685_v58 = vsel %vm681_vm5, %v665_v27, %v668_v20  ;;  %v689_v44 = vsel %vm681_vm5, %v668_v20, %v671_v37  ;;  %v807_v55 = vmul.f32 %v806_v47, %v1525_v43 }
  0xa9   :  { %v686_v60 = vsel %vm684_vm8, %v674_v49, 2102212464  ;;  %v690_v4 = vsel %vm684_vm8, %v677_v42, 920167782  ;;  %v693_v45 = vsel %vm681_vm5, %v671_v37, %v674_v49  ;;  %v694_v46 = vsel %vm684_vm8, %v680_v8, 1326507024 }
  0xaa   :  { %v894_v52 = vadd.s32 4294967294, %v600_v40  ;;  %v687_v48 = vsel %vm683_vm7, %v671_v37, %v686_v60  ;;  %v691_v2 = vsel %vm683_vm7, %v674_v49, %v690_v4  ;;  %v810_v59 = vmul.f32 %v809_v12, %v1523_v5 }
  0xab   :  { %v588_v63 = vadd.s32 %v1492_v14, %v1486_v38  ;;  %v692_v22 = vsel %vm682_vm6, %v689_v44, %v691_v2  ;;  %v695_v11 = vsel %vm683_vm7, %v677_v42, %v694_v46  ;;  %v802_v51 = vadd.f32 %v801_v21, %v799_v62 }
  0xac   :  { %vm895_vm9 = vcmp.lt.s32.totalorder %v894_v52, 0  ;;  %v688_v13 = vsel %vm682_vm6, %v685_v58, %v687_v48  ;;  %v696_v10 = vsel %vm682_vm6, %v693_v45, %v695_v11  ;;  %v489_v6 = vshrl.u32 %v1550_v0, %v487_v1 }
  0xad   :  { %v603_v34 = vsel %vm895_vm9, 0, %v894_v52  ;;  %v1601_v29 = vmul.u32.u64.low %v1562_v57, %v696_v10  ;;  %v1602_v32 = vmul.u32.u64.high %v1562_v57, %v696_v10, %v1601_v29  ;;  %804 = vst [vmem:[#allocation7 + $0x2] sm:$0x1] %v802_v51  ;;  %v493_v21 = vshll.u32 %v492_v16, 23 }
  0xae   :  { %v608_v53 = vsub.s32 4294967266, %v603_v34  ;;  %v604_v19 = vsub.s32 32, %v603_v34  ;;  %v1605_v38 = vmul.u32.u64.low %v1562_v57, %v692_v22  ;;  %v1606_v14 = vmul.u32.u64.high %v1562_v57, %v692_v22, %v1605_v38 }
  0xaf   :  { %v811_v26 = vadd.f32 %v810_v59, %v807_v55  ;;  %v813_v28 = vstv %s1575_s1  ;;  %v605_v24 = vshll.u32 %v1553_v3, %v603_v34  ;;  %v822_v12 = vstv %s1579_s30 }
  0xb0   :  { %v609_v25 = vadd.s32 127, %v608_v53  ;;  %v814_v47 = vmul.f32 %v813_v28, %v1538_v9  ;;  %v825_v27 = vstv %s1581_s4  ;;  %v606_v20 = vshrl.u32 %v588_v63, %v604_v19 }
  0xb1   :  { %v704_v62 = vmul.u32 %v1562_v57, %v688_v13  ;;  %v829_v40 = vstv %s1585_s5  ;;  %vm706_vm10 = vc.u32 %v1602_v32, %v1605_v38  ;;  %v707_v0 = vadd.s32 1, %v1606_v14 }
  0xb2   :  { %v610_v37 = vshll.u32 %v609_v25, 23  ;;  %v817_v1 = vstv %s1590_s6  ;;  %v823_v61 = vmul.f32 %v822_v12, %v1525_v43  ;;  %v490_v3 = vor.u32 %v489_v6, %v488_v17 }
  0xb3   :  { %v494_v31 = vor.u32 4788187, %v493_v21  ;;  %v815_v54 = vadd.f32 %v814_v47, %v811_v26  ;;  %v826_v35 = vmul.f32 %v825_v27, %v1523_v5  ;;  %v708_v56 = vsel %vm706_vm10, %v707_v0, %v1606_v14 }
  0xb4   :  { %v830_v57 = vmul.f32 %v829_v40, %v1538_v9  ;;  %v607_v52 = vor.u32 %v606_v20, %v605_v24  ;;  %v611_v49 = vor.u32 4788187, %v610_v37  ;;  %v709_v42 = vadd.s32 %v708_v56, %v704_v62 }
  0xb5   :  { %v818_v8 = vadd.f32 %v817_v1, %v815_v54  ;;  %v827_v58 = vadd.f32 %v826_v35, %v823_v61  ;;  %v495_v44 = vand.u32 2147483647, %v494_v31  ;;  %v497_v43 = vcvt.s32.f32 %v490_v3 }
  0xb6   :  { %v710_v60 = vadd.s32 536870912, %v709_v42  ;;  %v833_v39 = vstv %s1612_s7  ;;  %v612_v17 = vand.u32 2147483647, %v611_v49  ;;  %v614_v4 = vcvt.s32.f32 %v607_v52 }
  0xb7   :  { %820 = vst [vmem:[#allocation7 + $0x3] sm:$0x1] %v818_v8  ;;  %v831_v15 = vadd.f32 %v830_v57, %v827_v58  ;;  %v498_v34 = vmul.f32 %v497_v43, %v495_v44  ;;  %vm417_vm11 = vcmp.lt.s32.totalorder %v1249_v33, 0  ;;  %vm534_vm12 = vcmp.lt.s32.totalorder %v1327_v36, 0 }
  0xb8   :  { %v1631_v45 = vshrl.u32 %v710_v60, 30  ;;  %v615_v9 = vmul.f32 %v614_v4, %v612_v17  ;;  %vm1638_vm13 = vcmp.le.f32.partialorder %v415_v30, 0.7853982  ;;  %vm1646_vm14 = vcmp.le.f32.partialorder %v532_v41, 0.7853982 }
  0xb9   :  { %v834_v5 = vadd.f32 %v833_v39, %v831_v15  ;;  %v499_v46 = vxor.u32 2147483648, %v498_v34  ;;  %v705_v25 = vadd.s32 %v1605_v38, %v1602_v32  ;;  %v501_v24 = vsub.s32 4, %v1438_v7 }
  0xba   :  { %v712_v48 = vshll.u32 %v1631_v45, 30  ;;  %v616_v53 = vxor.u32 2147483648, %v615_v9  ;;  %v618_v32 = vsub.s32 4, %v1535_v50  ;;  %vm651_vm0 = vcmp.lt.s32.totalorder %v1471_v23, 0 }
  0xbb   :  { %836 = vst [vmem:[#allocation7 + $0x4] sm:$0x1] %v834_v5  ;;  %v500_v63 = vsel %vm417_vm11, %v499_v46, %v498_v34  ;;  %v502_v27 = vsel %vm417_vm11, %v501_v24, %v1438_v7  ;;  %vm1670_vm1 = vcmp.le.f32.partialorder %v649_v18, 0.7853982  ;;  %v735_v31 = vsub.s32 4, %v1631_v45 }
  0xbc   :  { %v713_v2 = vsub.s32 %v709_v42, %v712_v48  ;;  %v617_v51 = vsel %vm534_vm12, %v616_v53, %v615_v9  ;;  %v503_v30 = vsel %vm1638_vm13, %v1249_v33, %v500_v63  ;;  %v619_v20 = vsel %vm534_vm12, %v618_v32, %v1535_v50 }
  0xbd   :  { %v620_v13 = vsel %vm1646_vm14, %v1327_v36, %v617_v51  ;;  %971 = vcosq.f32 %v503_v30  ;;  %v504_v1 = vsel %vm1638_vm13, 0, %v502_v27  ;;  %v621_v7 = vsel %vm1646_vm14, 0, %v619_v20 }
  0xbe   :  { %v715_v16 = vsub.s32 0, %v713_v2  ;;  %973 = vsinq.f32 %v503_v30  ;;  %v508_v35 = vand.u32 3, %v504_v1  ;;  %v625_v56 = vand.u32 3, %v621_v7 }
  0xbf   :  { %975 = vcosq.f32 %v620_v13  ;;  %v736_v8 = vsel %vm651_vm0, %v735_v31, %v1631_v45  ;;  %vm507_vm8 = vweird.f32 %v1249_v33  ;;  %vm624_vm9 = vweird.f32 %v1327_v36 }
  0xc0   :  { %v901_v55 = vmin.u32 %v715_v16, %v713_v2  ;;  %977 = vsinq.f32 %v620_v13  ;;  %vm510_vm2 = vcmp.eq.s32.totalorder %v508_v35, 0  ;;  %vm513_vm3 = vcmp.eq.s32.totalorder %v508_v35, 2 }
  0xc1   :  { %vm627_vm4 = vcmp.eq.s32.totalorder %v625_v56, 0  ;;  %vm630_vm5 = vcmp.eq.s32.totalorder %v625_v56, 2  ;;  %vm509_vm6 = vcmp.lt.s32.totalorder %v508_v35, 2  ;;  %vm626_vm7 = vcmp.lt.s32.totalorder %v625_v56, 2 }
  0xc2   :  { %v717_v22 = vclz %v901_v55  ;;  %v738_v58 = vsel %vm1670_vm1, 0, %v736_v8  ;;  %vm741_vm13 = vweird.f32 %v1471_v23  ;;  %v762_v16 = vstv %s1691_s9 }
  0xc3   :  { %v742_v15 = vand.u32 3, %v738_v58  ;;  %v777_v53 = vstv %s1695_s11  ;;  %v759_v59 = vstv %s1689_s8  ;;  %v774_v11 = vstv %s1699_s12 }
  0xc4   :  { %v902_v19 = vadd.s32 4294967294, %v717_v22  ;;  %v766_v22 = vstv %s1693_s10  ;;  %v781_v51 = vstv %s1701_s13 }
  0xc5   :  { %vm747_vm10 = vcmp.eq.s32.totalorder %v742_v15, 2  ;;  %vm744_vm11 = vcmp.eq.s32.totalorder %v742_v15, 0  ;;  %vm743_vm12 = vcmp.lt.s32.totalorder %v742_v15, 2 }
  0xc6   :  { %vm903_vm15 = vcmp.lt.s32.totalorder %v902_v19, 0 }
  0xc7   :  { %v720_v10 = vsel %vm903_vm15, 0, %v902_v19 }
  0xc8   :  { %v721_v41 = vsub.s32 32, %v720_v10  ;;  %v722_v29 = vshll.u32 %v713_v2, %v720_v10  ;;  %v725_v14 = vsub.s32 4294967266, %v720_v10 }
  0xca   :  { %v723_v6 = vshrl.u32 %v705_v25, %v721_v41  ;;  %v726_v21 = vadd.s32 127, %v725_v14  ;;  %v972_v0 = vpop.eup %971 }
  0xcb   :  { %v974_v61 = vpop.eup %973  ;;  %v514_v57 = vxor.u32 2147483648, %v972_v0 }
  0xcc   :  { %v724_v26 = vor.u32 %v723_v6, %v722_v29  ;;  %v727_v28 = vshll.u32 %v726_v21, 23  ;;  %v976_v3 = vpop.eup %975  ;;  %v511_v52 = vxor.u32 2147483648, %v974_v61  ;;  %v770_v21 = vstv %s907_s14 }
  0xcd   :  { %v978_v54 = vpop.eup %977  ;;  %v631_v42 = vxor.u32 2147483648, %v976_v3  ;;  %v515_v43 = vsel %vm513_vm3, %v514_v57, %v974_v61 }
  0xce   :  { %v728_v38 = vor.u32 4788187, %v727_v28  ;;  %v731_v47 = vcvt.s32.f32 %v724_v26  ;;  %v628_v49 = vxor.u32 2147483648, %v978_v54  ;;  %v512_v44 = vsel %vm510_vm2, %v972_v0, %v511_v52 }
  0xcf   :  { %v632_v39 = vsel %vm630_vm5, %v631_v42, %v978_v54  ;;  %v516_v17 = vsel %vm509_vm6, %v512_v44, %v515_v43  ;;  %v785_v26 = vstv %s911_s15 }
  0xd0   :  { %v729_v12 = vand.u32 2147483647, %v728_v38  ;;  %v629_v60 = vsel %vm627_vm4, %v976_v3, %v628_v49  ;;  %v517_v5 = vsel %vm507_vm8, nan, %v516_v17 }
  0xd1   :  { %v633_v4 = vsel %vm626_vm7, %v629_v60, %v632_v39 }
  0xd2   :  { %v732_v37 = vmul.f32 %v731_v47, %v729_v12  ;;  %v634_v34 = vsel %vm624_vm9, nan, %v633_v4 }
  0xd3   :  { %v753_v2 = vmul.f32 %v634_v34, %v517_v5 }
  0xd4   :  { %v733_v40 = vxor.u32 2147483648, %v732_v37 }
  0xd5   :  { %v763_v25 = vmul.f32 %v762_v16, %v753_v2  ;;  %v778_v13 = vmul.f32 %v777_v53, %v753_v2 }
  0xd6   :  { %v734_v50 = vsel %vm651_vm0, %v733_v40, %v732_v37 }
  0xd7   :  { %v737_v18 = vsel %vm1670_vm1, %v1471_v23, %v734_v50 }
  0xd8   :  { %979 = vcosq.f32 %v737_v18 }
  0xd9   :  { %981 = vsinq.f32 %v737_v18 }
  0xe5   :  { %v980_v45 = vpop.eup %979 }
  0xe6   :  { %v982_v48 = vpop.eup %981  ;;  %v748_v33 = vxor.u32 2147483648, %v980_v45 }
  0xe7   :  { %v745_v36 = vxor.u32 2147483648, %v982_v48 }
  0xe8   :  { %v749_v9 = vsel %vm747_vm10, %v748_v33, %v982_v48 }
  0xe9   :  { %v746_v46 = vsel %vm744_vm11, %v980_v45, %v745_v36 }
  0xea   :  { %v750_v55 = vsel %vm743_vm12, %v746_v46, %v749_v9 }
  0xeb   :  { %v751_v63 = vsel %vm741_vm13, nan, %v750_v55 }
  0xec   :  { %v756_v19 = vmul.f32 %v751_v63, %v634_v34  ;;  %v757_v30 = vmul.f32 %v753_v2, %v751_v63 }
  0xee   :  { %v760_v10 = vmul.f32 %v759_v59, %v756_v19  ;;  %v767_v41 = vmul.f32 %v766_v22, %v757_v30  ;;  %v775_v23 = vmul.f32 %v774_v11, %v756_v19  ;;  %v782_v29 = vmul.f32 %v781_v51, %v757_v30 }
  0xf0   :  { %v764_v14 = vadd.f32 %v763_v25, %v760_v10  ;;  %v779_v6 = vadd.f32 %v778_v13, %v775_v23 }
  0xf2   :  { %v768_v28 = vadd.f32 %v767_v41, %v764_v14  ;;  %v783_v24 = vadd.f32 %v782_v29, %v779_v6 }
  0xf4   :  { %v771_v32 = vadd.f32 %v770_v21, %v768_v28  ;;  %v786_v38 = vadd.f32 %v785_v26, %v783_v24 }
  0xf6   :  { %772 = vst [vmem:[#allocation7] sm:$0x1] %v771_v32  ;;  %788 = vst [vmem:[#allocation7 + $0x1] sm:$0x1] %v786_v38 }
  0xf7   :  { %1022 = shalt.err (!%p1019_p9)
}
  0xf8   :  { %848 = dma.vmem_to_hbm [thread:$0]  %s843_s16, 80, %s1719_s3, [#allocation4], %s1039_s19, %s1039_s19, %s1040_s20  }
  0xf9   :  { %1035 = dma.done.wait [#allocation4], 80  }
  0xfa   :  { %1036 = vsyncadd [#allocation4], 4294967216 }
  0xfb   :  { %852 = vsyncpa [#allocation3], 1 }
  0xfc   :  { %853 = vsyncpa [#allocation4], 1 }
  0xfd   :  { %854 = vsyncpa [#allocation5], 1 }

</bundles_post_ra>
